<compile_context>
chip_gen: v7x
topology: tpu7x:2x2x1
jax: 0.10.0
libtpu: 0.0.40
codegen_flags: <defaults>
</compile_context>

<pallas_src>
import jax
import jax.numpy as jnp
from jax.experimental import pallas as pl
from jax.experimental.pallas import tpu as pltpu


def _make_divisible(v, divisor, min_value=None):
    if min_value is None:
        min_value = divisor
    new_v = max(min_value, int(v + divisor / 2) // divisor * divisor)
    if new_v < 0.9 * v:
        new_v += divisor
    return new_v


_HS_CONST = 0.16666666666666666  # matches HardSigmoid in the PyTorch reference


def _hard_sigmoid(x):
    # relu6(x + 3) * 1/6
    return jnp.clip(x + 3.0, 0.0, 6.0) * _HS_CONST


def _round_up(v, m):
    return -(-v // m) * m


def _pick_btile(n):
    # Largest images-per-step that still keeps the grid length >= 2 (both TCs on v7x).
    for bt in (8, 4, 2, 1):
        if n % bt == 0 and n // bt >= 2:
            return bt
    return 1


# ------------------------------ wrapper + kernel ---------------------------- #
def fused_mbconv(x_nchw, params, kernel_size=3):
    N, Cin, H, W = x_nchw.shape
    K = kernel_size
    pad = (K - 1) // 2
    Hp, Wp = H + 2 * pad, W + 2 * pad
    Lout = H * Wp                                   # "padded-row" output grid (W valid + 2*pad junk cols/row)
    max_shift = (K - 1) * Wp + (K - 1)
    Lpad = _round_up(max(Hp * Wp, Lout + max_shift), 128)   # lane-aligned per-image segment
    LEXTRA = 128                                    # covers the shifted-window tail of the last image
    B_TILE = _pick_btile(N)
    NB = N // B_TILE
    Wout = B_TILE * Lpad                            # per-step output lanes (multiple of 128)
    Win = Wout + LEXTRA
    CENTER = pad * Wp + pad                         # residual == center-tap window of the padded input

    HID = params['w1'].shape[0]
    CSE = params['wse1'].shape[0]
    OUP = params['w2'].shape[0]
    KKC = K * K * Cin
    identity = (Cin == OUP)                         # stride == 1 always in this kernel
    inv_hw = 1.0 / float(H * W)

    # ---- wrapper glue: a single padded/flattened f32 copy of the input, batched slabs ----
    x_pad = jnp.pad(x_nchw, ((0, 0), (0, 0), (pad, pad), (pad, pad)))            # (N,Cin,Hp,Wp)
    x_flat = jnp.pad(x_pad.reshape(N, Cin, Hp * Wp),
                     ((0, 0), (0, 0), (0, Lpad - Hp * Wp)))                       # (N,Cin,Lpad)
    x_slab = x_flat.reshape(NB, B_TILE, Cin, Lpad).transpose(0, 2, 1, 3).reshape(NB, Cin, Wout)
    x_slab = jnp.pad(x_slab, ((0, 0), (0, 0), (0, LEXTRA)))                       # (NB,Cin,Win) f32

    # valid-column mask within one Lpad image segment (for the SE average pool)
    col = jnp.arange(Lpad)
    mask = ((col < Lout) & (col % Wp < W)).astype(jnp.float32).reshape(1, Lpad)

    # Fold BN scales into weights IN F32, then cast the conv weight to bf16.
    w1_f = params['w1'] * params['scale1'][:, None, None, None]                   # (HID,Cin,K,K)
    # tap ordering: row t*Cin + c with t = kh*K + kw (matches the in-kernel stacking)
    w1_mat = jnp.transpose(w1_f, (0, 2, 3, 1)).reshape(HID, KKC).astype(jnp.bfloat16)
    w2_f = params['w2'][:, :, 0, 0] * params['scale2'][:, None]                   # (OUP,HID) f32 (gate folded in-kernel)

    # Pack all remaining small parameters into ONE f32 VMEM stream.
    PC = CSE + HID + 2
    wse1_2d = params['wse1'][:, :, 0, 0]            # (CSE, HID)
    wse2_2d = params['wse2'][:, :, 0, 0]            # (HID, CSE)
    pvec = jnp.zeros((HID + 1, PC), jnp.float32)
    pvec = pvec.at[:HID, 0:CSE].set(wse1_2d.T)                 # wse1^T  (HID,CSE)
    pvec = pvec.at[:CSE, CSE:CSE + HID].set(wse2_2d.T)         # wse2^T  (CSE,HID)
    pvec = pvec.at[:HID, CSE + HID].set(params['bias1'])       # folded BN1 bias
    pvec = pvec.at[:OUP, CSE + HID + 1].set(params['bias2'])   # folded BN2 bias
    pvec = pvec.at[HID, 0:CSE].set(params['bse1'])             # SE fc1 bias (row)
    pvec = pvec.at[HID, CSE:CSE + HID].set(params['bse2'])     # SE fc2 bias (row)

    def kernel(x_ref, mask_ref, w1_ref, w2_ref, pv_ref, out_ref):
        x32 = x_ref[0]                                                  # (Cin, Win) f32

        # 3x3 conv as ONE (HID,72)@(72,Wout) MXU matmul: stack the 9 lane-shifted windows
        # along sublanes (f32 slices are sublane-tile aligned), single bf16 cast to MXU.
        cols = jnp.concatenate(
            [x32[:, kh * Wp + kw: kh * Wp + kw + Wout]
             for kh in range(K) for kw in range(K)], axis=0).astype(jnp.bfloat16)   # (KKC, Wout)
        h = jnp.dot(w1_ref[...], cols, preferred_element_type=jnp.float32)          # (HID, Wout) f32

        pv = pv_ref[...]
        wse1_t = pv[:HID, 0:CSE]                                        # (HID, CSE)
        wse2_t = pv[:CSE, CSE:CSE + HID]                                # (CSE, HID)
        b1 = pv[:HID, CSE + HID:CSE + HID + 1]                          # (HID, 1)
        b2 = pv[:OUP, CSE + HID + 1:CSE + HID + 2]                      # (OUP, 1)
        bse1_row = pv[HID:HID + 1, 0:CSE]                               # (1, CSE)
        bse2_row = pv[HID:HID + 1, CSE:CSE + HID]                       # (1, HID)

        # folded BN1 bias + HardSwish (f32 on VPU/EUP)
        h = h + b1
        h = h * _hard_sigmoid(h)

        if B_TILE == 1:
            # Cast h early so the bf16 cast overlaps the SE reduction chain.
            h16 = h.astype(jnp.bfloat16)
            # SE: masked global average pool + fc1 as VPU broadcast-multiply / sublane reduce,
            # fc2 as one tiny row-producing matmul so the gate comes out lane-oriented.
            pooled = jnp.sum(h * mask_ref[...], axis=1, keepdims=True) * inv_hw     # (HID, 1)
            se1 = jnp.maximum(
                jnp.sum(wse1_t * pooled, axis=0, keepdims=True) + bse1_row, 0.0)    # (1, CSE)
            gate = _hard_sigmoid(
                jnp.dot(se1, wse2_t, preferred_element_type=jnp.float32) + bse2_row)  # (1, HID)
            # Fold SE gate into the projection weight: W2 @ (h*gate) == (W2*gate_row) @ h.
            w2g = (w2_ref[...] * gate).astype(jnp.bfloat16)                          # (OUP, HID)
            o = jnp.dot(w2g, h16, preferred_element_type=jnp.float32)               # (OUP, Wout)
        else:
            # Batched (B_TILE > 1) path: segmented SE pool + per-image gates applied to h.
            h3 = h.reshape(HID, B_TILE, Lpad)
            pooled = jnp.sum(h3 * mask_ref[...].reshape(1, 1, Lpad), axis=2) * inv_hw  # (HID,B)
            se1 = jnp.maximum(
                jax.lax.dot_general(wse1_t, pooled, (((0,), (0,)), ((), ())),
                                    preferred_element_type=jnp.float32)
                + bse1_row.reshape(CSE, 1), 0.0)                                       # (CSE,B)
            gate = _hard_sigmoid(
                jax.lax.dot_general(wse2_t, se1, (((0,), (0,)), ((), ())),
                                    preferred_element_type=jnp.float32)
                + bse2_row.reshape(HID, 1))                                            # (HID,B)
            hg = (h3 * gate[:, :, None]).reshape(HID, Wout).astype(jnp.bfloat16)
            o = jnp.dot(w2_ref[...].astype(jnp.bfloat16), hg,
                        preferred_element_type=jnp.float32)                            # (OUP, Wout)

        o = o + b2
        if identity:
            # Identity residual == the center-tap window of the f32 input slab (exact add).
            o = o + x32[:, CENTER:CENTER + Wout]
        out_ref[0] = o.astype(out_ref.dtype)                     # lane-dense, 128-aligned store

    out_slab = pl.pallas_call(
        kernel,
        out_shape=jax.ShapeDtypeStruct((NB, OUP, Wout), x_nchw.dtype),
        grid_spec=pltpu.PrefetchScalarGridSpec(
            num_scalar_prefetch=0,
            grid=(NB,),                                     # B_TILE images per step, grid kept >= 2
            in_specs=[
                pl.BlockSpec((1, Cin, Win), lambda g: (g, 0, 0)),   # input slab (f32)
                pl.BlockSpec((1, Lpad), lambda g: (0, 0)),          # per-segment valid mask
                pl.BlockSpec((HID, KKC), lambda g: (0, 0)),         # conv weight (BN1 folded, bf16)
                pl.BlockSpec((OUP, HID), lambda g: (0, 0)),         # projection weight (BN2 folded, f32)
                pl.BlockSpec((HID + 1, PC), lambda g: (0, 0)),      # packed small params (one stream)
            ],
            out_specs=pl.BlockSpec((1, OUP, Wout), lambda g: (g, 0, 0)),
        ),
        compiler_params=pltpu.CompilerParams(
            dimension_semantics=("parallel",),
            vmem_limit_bytes=32 * 1024 * 1024,   # sized for v7x's 64 MiB physical VMEM; tiny footprint here
        ),
        # NOTE: pipeline_mode=pl.Buffered(3) on the input slab only pays off once B_TILE
        # makes the per-step DMA large enough to expose latency (per review guidance).
    )(x_slab, mask, w1_mat, w2_f, pvec)

    # Unpack: drop per-segment junk columns; result is NCHW with no transpose of the spatial data.
    out = out_slab.reshape(NB, OUP, B_TILE, Lpad).transpose(0, 2, 1, 3).reshape(N, OUP, Lpad)
    return out[:, :, :Lout].reshape(N, OUP, H, Wp)[:, :, :, :W]


# ----------------------- pure-JAX reference (NCHW) ------------------------ #
def reference(x, p):
    y = jax.lax.conv_general_dilated(x, p['w1'], (1, 1), [(1, 1), (1, 1)],
                                     dimension_numbers=('NCHW', 'OIHW', 'NCHW'))
    y = y * p['scale1'][None, :, None, None] + p['bias1'][None, :, None, None]
    y = y * _hard_sigmoid(y)                                     # HardSwish
    s = jnp.mean(y, axis=(2, 3), keepdims=True)                  # AdaptiveAvgPool2d((1,1))
    s = jnp.einsum('nchw,oc->nohw', s, p['wse1'][:, :, 0, 0]) + p['bse1'][None, :, None, None]
    s = jnp.maximum(s, 0.0)
    s = jnp.einsum('nchw,oc->nohw', s, p['wse2'][:, :, 0, 0]) + p['bse2'][None, :, None, None]
    s = _hard_sigmoid(s)
    y = y * s
    o = jnp.einsum('nchw,oc->nohw', y, p['w2'][:, :, 0, 0])
    o = o * p['scale2'][None, :, None, None] + p['bias2'][None, :, None, None]
    return x + o                                                 # identity residual


def _bn_fold(gamma, beta, mean, var, eps=1e-5):
    scale = gamma / jnp.sqrt(var + eps)
    return scale, beta - mean * scale


if __name__ == "__main__":
    N, INP, H, W = 2, 8, 16, 16
    OUP = INP
    K = 3
    EXPAND = 4
    HID = INP * EXPAND                           # 32
    CSE = _make_divisible(HID // 4, 8)           # 8

    key = jax.random.PRNGKey(0)
    ks = jax.random.split(key, 20)
    nrm = lambda k, shape: jax.random.normal(k, shape, jnp.float32)

    # Deterministic synthetic parameters (eval-mode BatchNorm stats included).
    w1 = 0.1 * nrm(ks[0], (HID, INP, K, K))
    bn1_g = 1.0 + 0.1 * nrm(ks[1], (HID,))
    bn1_b = 0.1 * nrm(ks[2], (HID,))
    bn1_m = 0.1 * nrm(ks[3], (HID,))
    bn1_v = 1.0 + 0.1 * jnp.abs(nrm(ks[4], (HID,)))
    wse1 = 0.1 * nrm(ks[5], (CSE, HID, 1, 1))
    bse1 = 0.1 * nrm(ks[6], (CSE,))
    wse2 = 0.1 * nrm(ks[7], (HID, CSE, 1, 1))
    bse2 = 0.1 * nrm(ks[8], (HID,))
    w2 = 0.1 * nrm(ks[9], (OUP, HID, 1, 1))
    bn2_g = 1.0 + 0.1 * nrm(ks[10], (OUP,))
    bn2_b = 0.1 * nrm(ks[11], (OUP,))
    bn2_m = 0.1 * nrm(ks[12], (OUP,))
    bn2_v = 1.0 + 0.1 * jnp.abs(nrm(ks[13], (OUP,)))

    scale1, bias1 = _bn_fold(bn1_g, bn1_b, bn1_m, bn1_v)
    scale2, bias2 = _bn_fold(bn2_g, bn2_b, bn2_m, bn2_v)

    params = dict(w1=w1, scale1=scale1, bias1=bias1,
                  wse1=wse1, bse1=bse1, wse2=wse2, bse2=bse2,
                  w2=w2, scale2=scale2, bias2=bias2)

    x = nrm(ks[14], (N, INP, H, W))

    out = jax.block_until_ready(fused_mbconv(x, params, kernel_size=K))
    ref = jax.block_until_ready(reference(x, params))

    # TODO(synk): DropBlock2d training-mode stochastic masking not implemented
    # (it is an identity in eval mode, which is what this forward reproduces).
    assert out.shape == (N, OUP, H, W), out.shape
    if not jnp.allclose(out, ref, atol=2e-2, rtol=2e-2):
        raise AssertionError(
            f"mismatch vs reference: max abs err = {float(jnp.max(jnp.abs(out - ref)))}")
    print("KERNEL_OK")
</pallas_src>

<mosaic_0001>
module attributes {stable_mosaic.version = 11 : i64} {
  func.func @kernel(%arg0: i32, %arg1: memref<1x8x512xf32, #tpu.memory_space<vmem>>, %arg2: memref<1x384xf32, #tpu.memory_space<vmem>>, %arg3: memref<32x72xbf16, #tpu.memory_space<vmem>>, %arg4: memref<8x32xf32, #tpu.memory_space<vmem>>, %arg5: memref<33x42xf32, #tpu.memory_space<vmem>>, %arg6: memref<1x8x384xf32, #tpu.memory_space<vmem>>) attributes {dimension_semantics = [#tpu.dimension_semantics<parallel>], iteration_bounds = array<i64: 2>, scalar_prefetch = 0 : i64, scratch_operands = 0 : i64, tpu.core_type = #tpu.core_type<tc>, window_params = [{transform_indices = @transform_0, window_bounds = array<i64: 1, 8, 512>}, {pipeline_mode = #tpu.pipeline_mode<synchronous>, transform_indices = @transform_1, window_bounds = array<i64: 1, 384>}, {pipeline_mode = #tpu.pipeline_mode<synchronous>, transform_indices = @transform_2, window_bounds = array<i64: 32, 72>}, {pipeline_mode = #tpu.pipeline_mode<synchronous>, transform_indices = @transform_3, window_bounds = array<i64: 8, 32>}, {pipeline_mode = #tpu.pipeline_mode<synchronous>, transform_indices = @transform_4, window_bounds = array<i64: 33, 42>}, {transform_indices = @transform_5, window_bounds = array<i64: 1, 8, 384>}]} {
    %c0 = arith.constant 0 : index
    %c0_0 = arith.constant 0 : index
    %c0_1 = arith.constant 0 : index
    %0 = vector.load %arg1[%c0, %c0_0, %c0_1] : memref<1x8x512xf32, #tpu.memory_space<vmem>>, vector<1x8x512xf32>
    %1 = vector.shape_cast %0 : vector<1x8x512xf32> to vector<8x512xf32>
    %2 = vector.extract_strided_slice %1 {offsets = [0, 0], sizes = [8, 384], strides = [1, 1]} : vector<8x512xf32> to vector<8x384xf32>
    %3 = vector.extract_strided_slice %1 {offsets = [0, 1], sizes = [8, 384], strides = [1, 1]} : vector<8x512xf32> to vector<8x384xf32>
    %4 = vector.extract_strided_slice %1 {offsets = [0, 2], sizes = [8, 384], strides = [1, 1]} : vector<8x512xf32> to vector<8x384xf32>
    %5 = vector.extract_strided_slice %1 {offsets = [0, 18], sizes = [8, 384], strides = [1, 1]} : vector<8x512xf32> to vector<8x384xf32>
    %6 = vector.extract_strided_slice %1 {offsets = [0, 19], sizes = [8, 384], strides = [1, 1]} : vector<8x512xf32> to vector<8x384xf32>
    %7 = vector.extract_strided_slice %1 {offsets = [0, 20], sizes = [8, 384], strides = [1, 1]} : vector<8x512xf32> to vector<8x384xf32>
    %8 = vector.extract_strided_slice %1 {offsets = [0, 36], sizes = [8, 384], strides = [1, 1]} : vector<8x512xf32> to vector<8x384xf32>
    %9 = vector.extract_strided_slice %1 {offsets = [0, 37], sizes = [8, 384], strides = [1, 1]} : vector<8x512xf32> to vector<8x384xf32>
    %10 = vector.extract_strided_slice %1 {offsets = [0, 38], sizes = [8, 384], strides = [1, 1]} : vector<8x512xf32> to vector<8x384xf32>
    %11 = tpu.concatenate %2, %3, %4, %5, %6, %7, %8, %9, %10 in 0 : vector<8x384xf32>, vector<8x384xf32>, vector<8x384xf32>, vector<8x384xf32>, vector<8x384xf32>, vector<8x384xf32>, vector<8x384xf32>, vector<8x384xf32>, vector<8x384xf32> -> vector<72x384xf32>
    %12 = arith.truncf %11 : vector<72x384xf32> to vector<72x384xbf16>
    %c0_2 = arith.constant 0 : index
    %c0_3 = arith.constant 0 : index
    %13 = vector.load %arg3[%c0_2, %c0_3] : memref<32x72xbf16, #tpu.memory_space<vmem>>, vector<32x72xbf16>
    %cst = arith.constant dense<0.000000e+00> : vector<32x384xf32>
    %14 = tpu.matmul %13, %12, %cst {dimension_numbers = #tpu.dot_dimension_numbers<[1], [0], [0], [1], [0, 0, 1, 1], [], []>} : vector<32x72xbf16>, vector<72x384xbf16>, vector<32x384xf32> -> vector<32x384xf32>
    %c0_4 = arith.constant 0 : index
    %c0_5 = arith.constant 0 : index
    %15 = vector.load %arg5[%c0_4, %c0_5] : memref<33x42xf32, #tpu.memory_space<vmem>>, vector<33x42xf32>
    %16 = vector.extract_strided_slice %15 {offsets = [0, 0], sizes = [32, 8], strides = [1, 1]} : vector<33x42xf32> to vector<32x8xf32>
    %17 = vector.extract_strided_slice %15 {offsets = [0, 8], sizes = [8, 32], strides = [1, 1]} : vector<33x42xf32> to vector<8x32xf32>
    %18 = vector.extract_strided_slice %15 {offsets = [0, 40], sizes = [32, 1], strides = [1, 1]} : vector<33x42xf32> to vector<32x1xf32>
    %19 = vector.extract_strided_slice %15 {offsets = [0, 41], sizes = [8, 1], strides = [1, 1]} : vector<33x42xf32> to vector<8x1xf32>
    %20 = vector.extract_strided_slice %15 {offsets = [32, 0], sizes = [1, 8], strides = [1, 1]} : vector<33x42xf32> to vector<1x8xf32>
    %21 = vector.extract_strided_slice %15 {offsets = [32, 8], sizes = [1, 32], strides = [1, 1]} : vector<33x42xf32> to vector<1x32xf32>
    %22 = vector.broadcast %18 : vector<32x1xf32> to vector<32x384xf32>
    %23 = arith.addf %14, %22 : vector<32x384xf32>
    %cst_6 = arith.constant 3.000000e+00 : f32
    %24 = vector.broadcast %cst_6 : f32 to vector<32x384xf32>
    %25 = arith.addf %23, %24 : vector<32x384xf32>
    %cst_7 = arith.constant 0.000000e+00 : f32
    %cst_8 = arith.constant 6.000000e+00 : f32
    %26 = vector.broadcast %cst_7 : f32 to vector<32x384xf32>
    %27 = arith.maximumf %26, %25 : vector<32x384xf32>
    %28 = vector.broadcast %cst_8 : f32 to vector<32x384xf32>
    %29 = arith.minimumf %28, %27 : vector<32x384xf32>
    %cst_9 = arith.constant 0.166666672 : f32
    %30 = vector.broadcast %cst_9 : f32 to vector<32x384xf32>
    %31 = arith.mulf %29, %30 : vector<32x384xf32>
    %32 = arith.mulf %23, %31 : vector<32x384xf32>
    %33 = arith.truncf %32 : vector<32x384xf32> to vector<32x384xbf16>
    %c0_10 = arith.constant 0 : index
    %c0_11 = arith.constant 0 : index
    %34 = vector.load %arg2[%c0_10, %c0_11] : memref<1x384xf32, #tpu.memory_space<vmem>>, vector<1x384xf32>
    %35 = vector.broadcast %34 : vector<1x384xf32> to vector<32x384xf32>
    %36 = arith.mulf %32, %35 : vector<32x384xf32>
    %cst_12 = arith.constant dense<0.000000e+00> : vector<32xf32>
    %37 = vector.multi_reduction <add>, %36, %cst_12 [1] : vector<32x384xf32> to vector<32xf32>
    %38 = vector.shape_cast %37 : vector<32xf32> to vector<32x1xf32>
    %cst_13 = arith.constant 3.906250e-03 : f32
    %39 = vector.broadcast %cst_13 : f32 to vector<32x1xf32>
    %40 = arith.mulf %38, %39 : vector<32x1xf32>
    %41 = vector.broadcast %40 : vector<32x1xf32> to vector<32x8xf32>
    %42 = arith.mulf %16, %41 : vector<32x8xf32>
    %cst_14 = arith.constant dense<0.000000e+00> : vector<8xf32>
    %43 = vector.multi_reduction <add>, %42, %cst_14 [0] : vector<32x8xf32> to vector<8xf32>
    %44 = vector.shape_cast %43 : vector<8xf32> to vector<1x8xf32>
    %45 = arith.addf %44, %20 : vector<1x8xf32>
    %cst_15 = arith.constant 0.000000e+00 : f32
    %46 = vector.broadcast %cst_15 : f32 to vector<1x8xf32>
    %47 = arith.maximumf %45, %46 : vector<1x8xf32>
    %cst_16 = arith.constant dense<0.000000e+00> : vector<1x32xf32>
    %48 = tpu.matmul %47, %17, %cst_16 {dimension_numbers = #tpu.dot_dimension_numbers<[1], [0], [0], [1], [0, 0, 1, 1], [], []>} : vector<1x8xf32>, vector<8x32xf32>, vector<1x32xf32> -> vector<1x32xf32>
    %49 = arith.addf %48, %21 : vector<1x32xf32>
    %cst_17 = arith.constant 3.000000e+00 : f32
    %50 = vector.broadcast %cst_17 : f32 to vector<1x32xf32>
    %51 = arith.addf %49, %50 : vector<1x32xf32>
    %cst_18 = arith.constant 0.000000e+00 : f32
    %cst_19 = arith.constant 6.000000e+00 : f32
    %52 = vector.broadcast %cst_18 : f32 to vector<1x32xf32>
    %53 = arith.maximumf %52, %51 : vector<1x32xf32>
    %54 = vector.broadcast %cst_19 : f32 to vector<1x32xf32>
    %55 = arith.minimumf %54, %53 : vector<1x32xf32>
    %cst_20 = arith.constant 0.166666672 : f32
    %56 = vector.broadcast %cst_20 : f32 to vector<1x32xf32>
    %57 = arith.mulf %55, %56 : vector<1x32xf32>
    %c0_21 = arith.constant 0 : index
    %c0_22 = arith.constant 0 : index
    %58 = vector.load %arg4[%c0_21, %c0_22] : memref<8x32xf32, #tpu.memory_space<vmem>>, vector<8x32xf32>
    %59 = vector.broadcast %57 : vector<1x32xf32> to vector<8x32xf32>
    %60 = arith.mulf %58, %59 : vector<8x32xf32>
    %61 = arith.truncf %60 : vector<8x32xf32> to vector<8x32xbf16>
    %cst_23 = arith.constant dense<0.000000e+00> : vector<8x384xf32>
    %62 = tpu.matmul %61, %33, %cst_23 {dimension_numbers = #tpu.dot_dimension_numbers<[1], [0], [0], [1], [0, 0, 1, 1], [], []>} : vector<8x32xbf16>, vector<32x384xbf16>, vector<8x384xf32> -> vector<8x384xf32>
    %63 = vector.broadcast %19 : vector<8x1xf32> to vector<8x384xf32>
    %64 = arith.addf %62, %63 : vector<8x384xf32>
    %65 = vector.extract_strided_slice %1 {offsets = [0, 19], sizes = [8, 384], strides = [1, 1]} : vector<8x512xf32> to vector<8x384xf32>
    %66 = arith.addf %64, %65 : vector<8x384xf32>
    %c0_24 = arith.constant 0 : index
    %c0_25 = arith.constant 0 : index
    %c0_26 = arith.constant 0 : index
    %67 = vector.load %arg6[%c0_24, %c0_25, %c0_26] : memref<1x8x384xf32, #tpu.memory_space<vmem>>, vector<1x8x384xf32>
    %68 = vector.shape_cast %67 : vector<1x8x384xf32> to vector<8x384xf32>
    %69 = vector.shape_cast %66 : vector<8x384xf32> to vector<1x8x384xf32>
    tpu.vector_store %arg6[%c0_24, %c0_25, %c0_26], %69 {strides = array<i32>} : memref<1x8x384xf32, #tpu.memory_space<vmem>>, vector<1x8x384xf32>,
    return
  }
  func.func @transform_0(%arg0: i32) -> (i32, i32, i32) {
    %c0_i32 = arith.constant 0 : i32
    %c0_i32_0 = arith.constant 0 : i32
    %c0_i32_1 = arith.constant 0 : i32
    return %arg0, %c0_i32, %c0_i32_0 : i32, i32, i32
  }
  func.func @transform_1(%arg0: i32) -> (i32, i32) {
    %c0_i32 = arith.constant 0 : i32
    %c0_i32_0 = arith.constant 0 : i32
    %c0_i32_1 = arith.constant 0 : i32
    return %c0_i32, %c0_i32_0 : i32, i32
  }
  func.func @transform_2(%arg0: i32) -> (i32, i32) {
    %c0_i32 = arith.constant 0 : i32
    %c0_i32_0 = arith.constant 0 : i32
    %c0_i32_1 = arith.constant 0 : i32
    return %c0_i32, %c0_i32_0 : i32, i32
  }
  func.func @transform_3(%arg0: i32) -> (i32, i32) {
    %c0_i32 = arith.constant 0 : i32
    %c0_i32_0 = arith.constant 0 : i32
    %c0_i32_1 = arith.constant 0 : i32
    return %c0_i32, %c0_i32_0 : i32, i32
  }
  func.func @transform_4(%arg0: i32) -> (i32, i32) {
    %c0_i32 = arith.constant 0 : i32
    %c0_i32_0 = arith.constant 0 : i32
    %c0_i32_1 = arith.constant 0 : i32
    return %c0_i32, %c0_i32_0 : i32, i32
  }
  func.func @transform_5(%arg0: i32) -> (i32, i32, i32) {
    %c0_i32 = arith.constant 0 : i32
    %c0_i32_0 = arith.constant 0 : i32
    %c0_i32_1 = arith.constant 0 : i32
    return %arg0, %c0_i32, %c0_i32_0 : i32, i32, i32
  }
}

</mosaic_0001>

<bundles_post_ra>
// kernel: tpu_custom_call.1
= control target key start
LH: loop header
LB: loop body
LE: loop exit
PB: predicated region body
PF: predicated region fallthrough
CT: control target
= control target key end

     0   :  { %10 = vsyncpa [#allocation3], 0  ;;  %s1805_s0 = inlined_call_operand.hbm [shape: f32[2,8,512], index: 0, kind: input, shape index: {}]   ;;  %s1806_s1 = inlined_call_operand.vmem [shape: f32[1,384], index: 1, kind: input, shape index: {}]   ;;  %s1807_s2 = inlined_call_operand.hbm [shape: bf16[32,72], index: 2, kind: input, shape index: {}]   ;;  %s1808_s3 = inlined_call_operand.vmem [shape: f32[8,32], index: 3, kind: input, shape index: {}]   ;;  %s1809_s4 = inlined_call_operand.hbm [shape: f32[33,42], index: 4, kind: input, shape index: {}]   ;;  %s1810_s5 = inlined_call_operand.hbm [shape: f32[2,8,384], index: 5, kind: output, shape index: {}]  }
   0x1   :  { %12 = vsyncpa [#allocation3 + $0x1], 0 }
   0x2   :  { %13 = vsyncpa [#allocation6], 0 }
   0x3   :  { %14 = vsyncpa [#allocation4], 0 }
   0x4   :  { %16 = vsyncpa [#allocation4 + $0x1], 0  ;;  %s1421_s18 = smov 0   ;;  %s1423_s19 = smov 0  }
   0x5   :  { %s1425_s20 = smov 0   ;;  %s1427_s21 = smov 0  }
   0x6 LB: > { %s1442_s22 = sadd.s32 4294967295, %s1367_s21   ;;  %s997_s23 = sadd.s32 4294967294, %s1367_s21   ;;  %s1367_s21 = sphi %s1427_s21, %s1830_s21   ;;  %s1363_s20 = sphi %s1425_s20, %s1829_s20   ;;  %s1359_s19 = sphi %s1423_s19, %s1828_s19   ;;  %s1355_s18 = sphi %s1421_s18, %s1827_s18  }
   0x7   : > { %p42_p0 = scmp.ne.s32.totalorder %s1359_s19, %s1355_s18  ;;  %p1811_p1 = scmp.eq.s32.totalorder %s1442_s22, 0 }
   0x8   : > { %p156_p3 = scmp.eq.s32.totalorder %s997_s23, 1  ;;  %p998_p5 = scmp.ge.s32.totalorder %s1367_s21, 1 }
   0x9   : > { %p1451_p4 = por %p1811_p1, %p42_p0  ;;  %p163_p7 = scmp.lt.s32.totalorder %s1367_s21, 3 }
   0xa   : > { %p1456_p6 = por %p156_p3, %p42_p0  ;;  %s1369_s27 = smov [#allocation5]  }
   0xb   : > { %s1814_s24 = scalar_select %p1451_p4, 1, 0 }
   0xc   : > { %s1815_s25 = scalar_select %p1456_p6, 1, 0 }
   0xd   : > { %p1461_p8 = pnand %p998_p5, %p163_p7  ;;  %s178_s28 = sshll.u32 %s1369_s27, 4  ;;  %s1465_s28 = int_to_ptr.vmem [resolvable:$true] %s178_s28 }
   0xe   : > { %s1370_s30 = smov [#allocation7]   ;;  %s1211_s9 = scalar_lea.hbm %s1807_s2, 256 }
   0xf   : > { %p1077_p9 = pneg %p1461_p8  ;;  %s194_s6 = sshll.u32 %s1370_s30, 4  ;;  %s1476_s6 = int_to_ptr.vmem [resolvable:$true] %s194_s6 }
  0x10   : > { %p1212_p12 = scmp.ne.s32.totalorder %s1807_s2, %s1211_s9  ;;  %p1218_p5 = scmp.lt.u32.totalorder %s1211_s9, %s1807_s2 }
  0x11   : > { %p1472_p11 = pnand %p1077_p9, %p1811_p1 }
  0x13   : > { %p1213_p13 = pneg %p1472_p11 }
  0x15   : > { %p1214_p0 = pnand %p1213_p13, %p1212_p12 }
  0x17   : > { %p1215_p3 = pneg %p1214_p0 }
  0x19   : > { %p1220_p7 = pnand %p1218_p5, %p1215_p3 }
  0x1b   : > { %1223 = shalt.err (!%p1220_p7)
}
  0x1c   : > { %s1224_s14 = scalar_lea.vmem %s1465_s28, 256  ;;  %p1232_p2 = scmp.lt.s32.totalorder %s1465_s28, %s1465_s28 }
  0x1d   : > { %p1225_p9 = scmp.ne.s32.totalorder %s1465_s28, %s1224_s14  ;;  %p1233_p12 = scmp.lt.s32.totalorder %s1224_s14, %s1224_s14 }
  0x1f   : > { %p1227_p10 = pnand %p1225_p9, %p1213_p13  ;;  %p1234_p0 = por %p1233_p12, %p1232_p2 }
  0x21   : > { %p1228_p1 = pneg %p1227_p10 }
  0x23   : > { %p1235_p6 = pnand %p1234_p0, %p1228_p1 }
  0x25   : > { %1238 = shalt.err (!%p1235_p6)
}
  0x26   : > { %s1371_s15 = smov 64   ;;  %s1372_s16 = smov 4  }
  0x27   : > { %1080 = dma.hbm_to_vmem [thread:$0]  (!%p1472_p11), %s1807_s2, 256, %s1465_s28, [#allocation6], %s1371_s15, %s1371_s15, %s1372_s16  }
  0x28   : > { %s1239_s7 = scalar_lea.hbm %s1809_s4, 640 }
  0x29   : > { %p1240_p2 = scmp.ne.s32.totalorder %s1809_s4, %s1239_s7  ;;  %p1246_p10 = scmp.lt.u32.totalorder %s1239_s7, %s1809_s4 }
  0x2b   : > { %p1242_p1 = pnand %p1240_p2, %p1213_p13 }
  0x2d   : > { %p1243_p6 = pneg %p1242_p1 }
  0x2f   : > { %p1248_p3 = pnand %p1246_p10, %p1243_p6 }
  0x31   : > { %1251 = shalt.err (!%p1248_p3)
}
  0x32   : > { %s1252_s28 = scalar_lea.vmem %s1476_s6, 640  ;;  %p1260_p12 = scmp.lt.s32.totalorder %s1476_s6, %s1476_s6 }
  0x33   : > { %p1253_p5 = scmp.ne.s32.totalorder %s1476_s6, %s1252_s28  ;;  %p1261_p0 = scmp.lt.s32.totalorder %s1252_s28, %s1252_s28 }
  0x35   : > { %p1255_p7 = pnand %p1253_p5, %p1213_p13  ;;  %p1262_p2 = por %p1261_p0, %p1260_p12 }
  0x37   : > { %p1256_p9 = pneg %p1255_p7 }
  0x39   : > { %p1263_p1 = pnand %p1262_p2, %p1256_p9 }
  0x3b   : > { %1266 = shalt.err (!%p1263_p1)
}
  0x3c   : > { %s1373_s12 = smov 128   ;;  %s1374_s13 = smov 8  }
  0x3d   : > { %1083 = dma.hbm_to_vmem [thread:$0]  (!%p1472_p11), %s1809_s4, 640, %s1476_s6, [#allocation6], %s1373_s12, %s1373_s12, %s1374_s13  }
  0x3e   : > { %s1531_s16 = sadd.s32 1, %s1367_s21   ;;  %s29_s23 = sadd.s32 1, %s1363_s20 }
  0x3f   : > { %s26_s17 = ssub.s32 %s1367_s21, %s1531_s16  ;;  %p36_p6 = scmp.ne.s32.totalorder %s1363_s20, %s1359_s19 }
  0x40   : > { %p27_p13 = scmp.eq.s32.totalorder %s26_s17, 0  ;;  %p37_p10 = scmp.eq.s32.totalorder %s1367_s21, 0 }
  0x41   : > { %p1818_p5 = scmp.eq.s32.totalorder %s1442_s22, 1  ;;  %p1094_p9 = scmp.lt.s32.totalorder %s1367_s21, 2 }
  0x42   : > { %s1540_s27 = scalar_select %p27_p13, %s1363_s20, %s29_s23  }
  0x43   : > { %p38_p3 = por %p37_p10, %p36_p6  ;;  %p1544_p7 = por %p1818_p5, %p36_p6 }
  0x44   : > { %s208_s29 = sand.u32 1, %s1363_s20   ;;  %s1022_s6 = sshll.u32 %s1367_s21, 9 }
  0x45   : > { %s1819_s30 = scalar_select %p1544_p7, 1, 0 }
  0x46   : > { %s1002_s7 = sshll.u32 %s208_s29, 5  ;;  %s1554_s10 = scalar_lea.hbm %s1805_s0, %s1022_s6 }
  0x47   : > { %s212_s11 = scalar_lea.vmem [#allocation2], %s1002_s7  ;;  %p1558_p11 = pnand %p1094_p9, %p38_p3 }
  0x48   : > { %s220_s28 = sshll.u32 %s212_s11, 4  ;;  %s209_s13 = scalar_lea.sflag [#allocation3], %s208_s29  ;;  %s1556_s28 = int_to_ptr.vmem [resolvable:$true] %s220_s28 }
  0x49   : > { %s1267_s14 = scalar_lea.hbm %s1554_s10, 512  ;;  %p1269_p0 = pneg %p1558_p11 }
  0x4a   : > { %p1268_p12 = scmp.ne.s32.totalorder %s1554_s10, %s1267_s14  ;;  %s1272_s23 = scalar_lea.hbm %s1805_s0, 1024 }
  0x4b   : > { %p1273_p13 = scmp.lt.u32.totalorder %s1554_s10, %s1805_s0  ;;  %p1274_p6 = scmp.lt.u32.totalorder %s1272_s23, %s1267_s14 }
  0x4c   : > { %p1270_p2 = pnand %p1269_p0, %p1268_p12  ;;  %p1276_p3 = scmp.lt.u32.totalorder %s1267_s14, %s1554_s10 }
  0x4d   : > { %p1275_p10 = por %p1274_p6, %p1273_p13 }
  0x4e   : > { %p1271_p1 = pneg %p1270_p2 }
  0x4f   : > { %p1277_p5 = por %p1276_p3, %p1275_p10 }
  0x51   : > { %p1278_p9 = pnand %p1277_p5, %p1271_p1 }
  0x53   : > { %1281 = shalt.err (!%p1278_p9)
}
  0x54   : > { %s1282_s29 = scalar_lea.vmem %s1556_s28, 512  ;;  %s1375_s8 = smov [#allocation2]  }
  0x55   : > { %p1283_p12 = scmp.ne.s32.totalorder %s1556_s28, %s1282_s29  ;;  %s1287_s9 = sshll.u32 %s1375_s8, 4  ;;  %s1288_s9 = int_to_ptr.vmem [resolvable:$false] %s1287_s9 }
  0x56   : > { %s1289_s11 = scalar_lea.vmem %s1288_s9, 1024  ;;  %p1290_p4 = scmp.lt.s32.totalorder %s1556_s28, %s1288_s9 }
  0x57   : > { %p1285_p2 = pnand %p1283_p12, %p1269_p0  ;;  %p1291_p13 = scmp.lt.s32.totalorder %s1289_s11, %s1282_s29 }
  0x59   : > { %p1286_p7 = pneg %p1285_p2  ;;  %p1292_p6 = por %p1291_p13, %p1290_p4 }
  0x5b   : > { %p1293_p10 = pnand %p1292_p6, %p1286_p7 }
  0x5d   : > { %1296 = shalt.err (!%p1293_p10)
}
  0x5e   : > { %1087 = dma.hbm_to_vmem [thread:$0]  (!%p1558_p11), %s1554_s10, 512, %s1556_s28, %s209_s13  }
  0x5f   : > { %229 = sbr.rel (%p1461_p8) target bundleno = 1138 (0x472), region = 40  ;;  %s1590_s14 = sand.u32 (!%p1461_p8), 1, %s1359_s19  }
  0x60   : > { %s1006_s15 = sshll.u32 (!%p1461_p8), %s1590_s14, 5  ;;  %s232_s17 = scalar_lea.sflag (!%p1461_p8), [#allocation3], %s1590_s14 }
  0x61   : > { %s235_s23 = scalar_lea.vmem (!%p1461_p8), [#allocation2], %s1006_s15  ;;  %p1821_p4 = scmp.ne.s32.totalorder (!%p1461_p8), %s1814_s24, 0 }
  0x66   : > { %1342 = dma.done.wait (%p1821_p4), %s232_s17, 512  }
  0x67   : > { %1344 = vsyncadd (%p1821_p4), %s232_s17, 4294966784  ;;  %p1822_p7 = scmp.eq.s32.totalorder %s1442_s22, 0 }
  0x69   : > { %1346 = dma.done.wait (%p1822_p7), [#allocation6], 896   ;;  %p1823_p11 = pmov %p1822_p7 }
  0x6a   : > { %v1602_v0 = vld [vmem:[%s235_s23 + $0x8] sm:$0xff]  ;;  %v1604_v1 = vld [vmem:[%s235_s23 + $0x10] sm:$0xff]  ;;  %v1606_v2 = vld [vmem:[%s235_s23] sm:$0xff]  ;;  %s1376_s26 = smov 126   ;;  %s1377_s24 = smov 127   ;;  %vm453_vm0 = vcmask 588800  }
  0x6b   : > { %1348 = vsyncadd (%p1823_p11), [#allocation6], 4294966400  ;;  %v1160_v3 = vpack.i.bf16 %v1604_v1, %v1602_v0  ;;  %v274_v4 = vld [vmem:[%s235_s23 + $0x18] sm:$0xff]  ;;  %s1378_s10 = smov 110   ;;  %s1379_s28 = smov 109   ;;  %v1615_v6 = vld [vmem:[#allocation5] sm:$0xff]   ;;  %v1200_v7 = vpack.i.bf16 %v1602_v0, %v1606_v2 }
  0x6c   : > { %v1155_v5 = vpack.i.bf16 %v274_v4, %v1606_v2  ;;  %s1380_s12 = smov 108   ;;  %s1381_s13 = smov 92   ;;  %v1383_v8 = vmov 0   ;;  %1045 = vmatprep.mubr.msk.bf16.mxu1 %vm453_vm0, %v1615_v6  ;;  %v1385_v9 = vmov 40   ;;  %v1624_v10 = vld [vmem:[#allocation7] sm:$0xff]  ;;  %v1627_v11 = vld [vmem:[#allocation7 + $0x10] sm:$0xff] }
  0x6d   : > { %1161 = vrot.lane.b32.xlu1 %v1160_v3, %s1376_s26  ;;  %1151 = vrot.lane.b32.xlu0 %v1160_v3, %s1377_s24  ;;  %s1382_s7 = smov 91   ;;  %s1384_s6 = smov 90   ;;  %v1629_v12 = vld [vmem:[#allocation7 + $0x8] sm:$0xff]  ;;  %v1633_v13 = vld [vmem:[#allocation7 + $0x18] sm:$0xff]  ;;  %vm287_vm1 = vcmask 1039360   ;;  %vm302_vm2 = vcmask 1031168  }
  0x6e   : > { %502 = vmatprep.mubr.bf16.mxu0 %v1383_v8  ;;  %1205 = vset.pattern.permute.xlu1 %v1385_v9  ;;  %vm317_vm3 = vcmask 900096   ;;  %vm332_vm4 = vcmask 891904   ;;  %vm347_vm5 = vcmask 883712   ;;  %vm362_vm6 = vcmask 752640   ;;  %s1386_s9 = smov 120   ;;  %s1063_s17 = smul.u32 24, %s1590_s14 }
  0x6f   : > { %1206 = vset.pattern.permute.xlu0 %v1385_v9  ;;  %vm377_vm7 = vcmask 744448   ;;  %vm392_vm8 = vcmask 736256   ;;  %vm460_vm9 = vcmask 1043456   ;;  %vm1388_vm10 = vmmov 0   ;;  %s1064_s23 = smul.u32 384, %s1442_s22  ;;  %p1824_p0 = scmp.ne.s32.totalorder %s1819_s30, 0 }
  0x70   : > { %vm691_vm11 = vcmask 64512   ;;  %vm802_vm12 = vcmask 261120  }
  0x71   : > { %1166 = vrot.lane.b32.xlu1 %v1160_v3, %s1378_s10  ;;  %1156 = vrot.lane.b32.xlu0 %v1155_v5, %s1377_s24 }
  0x75   : > { %1176 = vrot.lane.b32.xlu1 %v1155_v5, %s1378_s10  ;;  %1171 = vrot.lane.b32.xlu0 %v1155_v5, %s1376_s26  ;;  %s269_s26 = scalar_lea.vmem [#allocation8], %s1063_s17 }
  0x76   : > { %s908_s24 = sshll.u32 %s269_s26, 4  ;;  %s1763_s24 = int_to_ptr.vmem [resolvable:$true] %s908_s24 }
  0x79   : > { %328 = vrot.lane.b32.xlu1 %v1604_v1, %s1379_s28  ;;  %326 = vrot.lane.b32.xlu0 %v1602_v0, %s1379_s28 }
  0x7d   : > { %324 = vrot.lane.b32.xlu1 %v1606_v2, %s1379_s28  ;;  %1181 = vrot.lane.b32.xlu0 %v1160_v3, %s1380_s12 }
  0x81   : > { %1191 = vrot.lane.b32.xlu1 %v1160_v3, %s1381_s13  ;;  %1186 = vrot.lane.b32.xlu0 %v1155_v5, %s1380_s12  ;;  %s894_s12 = scalar_lea.sflag [#allocation4], %s1590_s14 }
  0x85   : > { %354 = vrot.lane.b32.xlu1 %v1606_v2, %s1381_s13  ;;  %1196 = vrot.lane.b32.xlu0 %v1160_v3, %s1382_s7 }
  0x89   : > { %330 = vrot.lane.b32.xlu1 %v274_v4, %s1379_s28  ;;  %369 = vrot.lane.b32.xlu0 %v1606_v2, %s1382_s7  ;;  %s1761_s28 = scalar_lea.hbm %s1810_s5, %s1064_s23 }
  0x8d   : > { %388 = vrot.lane.b32.xlu1 %v1604_v1, %s1384_s6  ;;  %1201 = vrot.lane.b32.xlu0 %v1200_v7, %s1384_s6 }
  0x91   : > { %375 = vrot.lane.b32.xlu1 %v274_v4, %s1382_s7  ;;  %360 = vrot.lane.b32.xlu0 %v274_v4, %s1381_s13  ;;  %s1297_s13 = scalar_lea.vmem %s1763_s24, 384  ;;  %s1390_s7 = smov [#allocation8]  }
  0x92   : > { %p1298_p8 = scmp.ne.s32.totalorder %s1763_s24, %s1297_s13 }
  0x94   : > { %p1299_p1 = pnand %p1298_p8, %p1824_p0 }
  0x95   : > { %390 = vrot.lane.b32.xlu0 %v274_v4, %s1384_s6  ;;  %425 = vperm.xlu1 %1205, %v1624_v10   ;;  %s1301_s6 = sshll.u32 %s1390_s7, 4  ;;  %s1302_s6 = int_to_ptr.vmem [resolvable:$false] %s1301_s6 }
  0x96   : > { %p1300_p3 = pneg %p1299_p1  ;;  %s1303_s29 = scalar_lea.vmem %s1302_s6, 768 }
  0x97   : > { %p1304_p5 = scmp.lt.s32.totalorder %s1763_s24, %s1302_s6  ;;  %p1305_p9 = scmp.lt.s32.totalorder %s1303_s29, %s1297_s13 }
  0x99   : > { %435 = vperm.xlu1 %1205, %v1627_v11   ;;  %430 = vperm.xlu0 %1206, %v1629_v12   ;;  %p1306_p12 = por %p1305_p9, %p1304_p5 }
  0x9b   : > { %p1307_p2 = pnand %p1306_p12, %p1300_p3 }
  0x9d   : > { %440 = vperm.xlu1 %1205, %v1633_v13  }
  0xdf   : > { %v1162_v14 = vpop.permute.xlu1 %1161  ;;  %v1152_v15 = vpop.permute.xlu0 %1151 }
  0xe0   : > { %v1154_v16 = vunpack.i.h.bf16 %v1152_v15  ;;  %v1153_v17 = vunpack.i.l.bf16 %v1152_v15  ;;  %v1164_v18 = vunpack.i.h.bf16 %v1162_v14  ;;  %v1163_v19 = vunpack.i.l.bf16 %v1162_v14 }
  0xe2   : > { %v289_v20 = vsel %vm287_vm1, %v1153_v17, %v1154_v16  ;;  %v304_v30 = vsel %vm302_vm2, %v1163_v19, %v1164_v18 }
  0xe3   : > { %v1167_v21 = vpop.permute.xlu1 %1166  ;;  %v1157_v22 = vpop.permute.xlu0 %1156  ;;  %v400_v23 = vpack.c.bf16 %v289_v20, %v1602_v0 }
  0xe4   : > { %v1169_v24 = vunpack.i.h.bf16 %v1167_v21  ;;  %v1168_v25 = vunpack.i.l.bf16 %v1167_v21  ;;  %v1159_v26 = vunpack.i.h.bf16 %v1157_v22  ;;  %v1158_v27 = vunpack.i.l.bf16 %v1157_v22 }
  0xe5   : > { %470 = vmatprep.subr.bf16.mxu0 %v400_v23 }
  0xe6   : > { %v288_v28 = vsel %vm287_vm1, %v1158_v27, %v1153_v17  ;;  %v290_v29 = vsel %vm287_vm1, %v1154_v16, %v1159_v26  ;;  %v319_v31 = vsel %vm317_vm3, %v1168_v25, %v1169_v24 }
  0xe7   : > { %v1177_v32 = vpop.permute.xlu1 %1176  ;;  %v1172_v33 = vpop.permute.xlu0 %1171  ;;  %v399_v34 = vpack.c.bf16 %v288_v28, %v1606_v2  ;;  %v401_v35 = vpack.c.bf16 %v290_v29, %v1604_v1  ;;  %v403_v36 = vpack.c.bf16 %v319_v31, %v304_v30 }
  0xe8   : > { %v1179_v37 = vunpack.i.h.bf16 %v1177_v32  ;;  %v1178_v38 = vunpack.i.l.bf16 %v1177_v32  ;;  %v1174_v39 = vunpack.i.h.bf16 %v1172_v33  ;;  %v1173_v40 = vunpack.i.l.bf16 %v1172_v33 }
  0xe9   : > { %471 = vmatpush1.bf16.msra.mxu0 %v399_v34  ;;  %1035 = vmatprep.subr.bf16.mxu1 %v401_v35 }
  0xea   : > { %472 = vmatprep.subr.bf16.mxu0 %v403_v36  ;;  %1036 = vmatpush3.bf16.msra.mxu1 %v401_v35  ;;  %v303_v41 = vsel %vm302_vm2, %v1173_v40, %v1163_v19  ;;  %v318_v42 = vsel %vm317_vm3, %v1178_v38, %v1168_v25  ;;  %v305_v43 = vsel %vm302_vm2, %v1164_v18, %v1174_v39  ;;  %v1210_v40 = vld [vmem:[#allocation5 + $0x8] sm:$0xff]  }
  0xeb   : > { %v329_v44 = vpop.permute.xlu1 %328  ;;  %v327_v45 = vpop.permute.xlu0 %326  ;;  %v402_v46 = vpack.c.bf16 %v318_v42, %v303_v41  ;;  %v320_v47 = vsel %vm317_vm3, %v1169_v24, %v1179_v37  ;;  %v640_v41 = vlaneseq }
  0xec   : > { %v404_v48 = vpack.c.bf16 %v320_v47, %v305_v43  ;;  %v1649_v53 = vsel %vm332_vm4, %v327_v45, %v329_v44 }
  0xed   : > { %473 = vmatpush1.bf16.msra.mxu0 %v402_v46  ;;  %v1682_v43 = vshrl.u32 %v640_v41, 7 }
  0xee   : > { %1037 = vmatprep.subr.bf16.mxu1 %v404_v48 }
  0xef   : > { %1038 = vmatpush3.bf16.msra.mxu1 %v404_v48  ;;  %v325_v49 = vpop.permute.xlu1 %324  ;;  %v1182_v50 = vpop.permute.xlu0 %1181  ;;  %v642_v48 = vsub.s32 0, %v1682_v43 }
  0xf0   : > { %v1184_v51 = vunpack.i.h.bf16 %v1182_v50  ;;  %v1183_v52 = vunpack.i.l.bf16 %v1182_v50  ;;  %v1654_v59 = vsel %vm332_vm4, %v325_v49, %v327_v45 }
  0xf2   : > { %v349_v54 = vsel %vm347_vm5, %v1183_v52, %v1184_v51 }
  0xf3   : > { %v1192_v55 = vpop.permute.xlu1 %1191  ;;  %v1187_v56 = vpop.permute.xlu0 %1186  ;;  %v406_v57 = vpack.c.bf16 %v349_v54, %v1649_v53 }
  0xf4   : > { %v1188_v58 = vunpack.i.l.bf16 %v1187_v56  ;;  %v1194_v60 = vunpack.i.h.bf16 %v1192_v55  ;;  %v1193_v61 = vunpack.i.l.bf16 %v1192_v55  ;;  %v1189_v2 = vunpack.i.h.bf16 %v1187_v56 }
  0xf5   : > { %474 = vmatprep.subr.bf16.mxu0 %v406_v57 }
  0xf6   : > { %v348_v62 = vsel %vm347_vm5, %v1188_v58, %v1183_v52  ;;  %v364_v5 = vsel %vm362_vm6, %v1193_v61, %v1194_v60  ;;  %v350_v18 = vsel %vm347_vm5, %v1184_v51, %v1189_v2  ;;  %v646_v52 = vsub.s32 1, %v1682_v43 }
  0xf7   : > { %v355_v63 = vpop.permute.xlu1 %354  ;;  %v1197_v0 = vpop.permute.xlu0 %1196  ;;  %v405_v1 = vpack.c.bf16 %v348_v62, %v1654_v59 }
  0xf8   : > { %v1199_v3 = vunpack.i.h.bf16 %v1197_v0  ;;  %v1198_v4 = vunpack.i.l.bf16 %v1197_v0  ;;  %v363_v16 = vsel %vm362_vm6, %v355_v63, %v1193_v61 }
  0xf9   : > { %475 = vmatpush1.bf16.msra.mxu0 %v405_v1 }
  0xfa   : > { %v379_v7 = vsel %vm377_vm7, %v1198_v4, %v1199_v3 }
  0xfb   : > { %v331_v9 = vpop.permute.xlu1 %330  ;;  %v370_v14 = vpop.permute.xlu0 %369  ;;  %v409_v15 = vpack.c.bf16 %v379_v7, %v364_v5 }
  0xfc   : > { %v1662_v17 = vsel %vm332_vm4, %v329_v44, %v331_v9  ;;  %v378_v19 = vsel %vm377_vm7, %v370_v14, %v1198_v4 }
  0xfd   : > { %v407_v20 = vpack.c.bf16 %v350_v18, %v1662_v17  ;;  %v408_v21 = vpack.c.bf16 %v378_v19, %v363_v16  ;;  %476 = vmatprep.subr.bf16.mxu0 %v409_v15  ;;  %v650_v19 = vsub.s32 2, %v1682_v43 }
  0xff   : > { %v389_v22 = vpop.permute.xlu1 %388  ;;  %v1202_v23 = vpop.permute.xlu0 %1201  ;;  %477 = vmatpush1.bf16.msra.mxu0 %v408_v21  ;;  %1039 = vmatprep.subr.bf16.mxu1 %v407_v20 }
 0x100   : > { %v1204_v24 = vunpack.i.h.bf16 %v1202_v23  ;;  %v1203_v25 = vunpack.i.l.bf16 %v1202_v23  ;;  %1040 = vmatpush3.bf16.msra.mxu1 %v407_v20 }
 0x102   : > { %v394_v26 = vsel %vm392_vm8, %v1204_v24, %v389_v22  ;;  %v393_v27 = vsel %vm392_vm8, %v1203_v25, %v1204_v24 }
 0x103   : > { %v412_v28 = vpack.c.bf16 %v394_v26, %v394_v26  ;;  %v376_v29 = vpop.permute.xlu1 %375  ;;  %v361_v30 = vpop.permute.xlu0 %360  ;;  %v411_v31 = vpack.c.bf16 %v393_v27, %v393_v27 }
 0x104   : > { %v380_v32 = vsel %vm377_vm7, %v1199_v3, %v376_v29  ;;  %v365_v33 = vsel %vm362_vm6, %v1194_v60, %v361_v30 }
 0x105   : > { %v410_v34 = vpack.c.bf16 %v380_v32, %v365_v33  ;;  %1011 = vmatprep.subr.msk.bf16.mxu0 %vm460_vm9, %v412_v28  ;;  %v462_v35 = vsel %vm460_vm9, %v411_v31, 0 }
 0x106   : > { %479 = vmatpush1.bf16.msra.mxu0 %v462_v35 }
 0x107   : > { %v391_v36 = vpop.permute.xlu0 %390  ;;  %1041 = vmatprep.subr.bf16.mxu1 %v410_v34 }
 0x108   : > { %v395_v37 = vsel %vm392_vm8, %v389_v22, %v391_v36  ;;  %1042 = vmatpush3.bf16.msra.mxu1 %v410_v34 }
 0x109   : > { %v413_v38 = vpack.c.bf16 %v395_v37, %v395_v37  ;;  %1012 = vmatmul.mubr.msk.bf16.vlgmr.msra.gmra.mrb[0].mxu0 %vm453_vm0, %v1615_v6 }
 0x10a   : > { %512 = vmatprep.mubr.bf16.mxu0 %v1383_v8 }
 0x10b   : > { %1062 = vmatprep.subr.msk.bf16.mxu1 %vm460_vm9, %v413_v38  ;;  %v468_v39 = vsel %vm460_vm9, %v413_v38, 0 }
 0x10c   : > { %1044 = vmatpush3.bf16.msra.mxu1 %v468_v39 }
 0x10f   : > { %1046 = vmatmul.mubr.msk.bf16.vlgmr.msra.gmra.mrb[0].mxu1 %vm453_vm0, %v1210_v40 }
 0x111   : > { %1013 = vmatmul.mubr.msk.bf16.gmra.mrb[4].mxu0 %vm453_vm0, %v1210_v40 }
 0x112   : > { %838 = vmatprep.mubr.bf16.mxu0 %v1383_v8  ;;  %v638_v8 = vld [vmem:[%s1806_s1] sm:$0x7] }
 0x113   : > { %v1697_v61 = vrot.slane %v638_v8, %v642_v48  ;;  %v1699_v2 = vrot.slane %v638_v8, %v646_v52 }
 0x114   : > { %v426_v42 = vpop.permute.xlu1 %425 }
 0x118   : > { %v1684_v6 = vpop.permute.xlu0 %430  ;;  %v1686_v46 = vpop.permute.xlu1 %435 }
 0x11c   : > { %v441_v4 = vpop.permute.xlu1 %440 }
 0x1dc   : > { %v504_v44 = vpop.f32.mrb[0].mxu0 }
 0x1dd   : > { %v505_v45 = vadd.f32 %v504_v44, %v426_v42  ;;  %v506_v47 = vpop.f32.mrb[1].mxu0  ;;  %v1704_v44 = vrot.slane %v638_v8, %v650_v19 }
 0x1de   : > { %v507_v49 = vadd.f32 %v506_v47, %v426_v42  ;;  %v508_v50 = vpop.f32.mrb[2].mxu0 }
 0x1df   : > { %v572_v51 = vadd.f32 3.0, %v505_v45  ;;  %v509_v54 = vadd.f32 %v508_v50, %v1684_v6  ;;  %v510_v55 = vpop.f32.mrb[3].mxu0 }
 0x1e0   : > { %v573_v56 = vadd.f32 3.0, %v507_v49  ;;  %v511_v57 = vadd.f32 %v510_v55, %v1684_v6 }
 0x1e1   : > { %v584_v58 = vmax.f32 %v572_v51, 0.0  ;;  %v575_v60 = vadd.f32 3.0, %v509_v54 }
 0x1e2   : > { %v585_v62 = vmax.f32 %v573_v56, 0.0  ;;  %v576_v63 = vadd.f32 3.0, %v511_v57  ;;  %v1047_v0 = vpop.f32.mrb[0].mxu1 }
 0x1e3   : > { %v596_v1 = vmin.f32 %v584_v58, 6.0  ;;  %v587_v3 = vmax.f32 %v575_v60, 0.0  ;;  %v566_v5 = vadd.f32 %v1047_v0, %v1686_v46  ;;  %v557_v7 = vpop.f32.mrb[1].mxu1 }
 0x1e4   : > { %v597_v9 = vmin.f32 %v585_v62, 6.0  ;;  %v588_v14 = vmax.f32 %v576_v63, 0.0  ;;  %v558_v15 = vadd.f32 %v557_v7, %v426_v42  ;;  %v514_v16 = vpop.f32.mrb[4].mxu0  ;;  %v1048_v18 = vpop.f32.mrb[2].mxu1 }
 0x1e5   : > { %v608_v20 = vmul.f32 0.16666667, %v596_v1  ;;  %v599_v21 = vmin.f32 %v587_v3, 6.0  ;;  %v580_v22 = vadd.f32 3.0, %v566_v5  ;;  %v515_v23 = vadd.f32 %v514_v16, %v1686_v46  ;;  %v516_v24 = vpop.f32.mrb[5].mxu0  ;;  %v560_v25 = vpop.f32.mrb[3].mxu1 }
 0x1e6   : > { %v609_v26 = vmul.f32 0.16666667, %v597_v9  ;;  %v600_v27 = vmin.f32 %v588_v14, 6.0  ;;  %v574_v28 = vadd.f32 3.0, %v558_v15  ;;  %v569_v29 = vadd.f32 %v1048_v18, %v441_v4  ;;  %v518_v30 = vpop.f32.mrb[6].mxu0 }
 0x1e7   : > { %v620_v31 = vmul.f32 %v608_v20, %v505_v45  ;;  %v611_v32 = vmul.f32 0.16666667, %v599_v21  ;;  %v592_v33 = vmax.f32 %v580_v22, 0.0  ;;  %v578_v34 = vadd.f32 3.0, %v515_v23  ;;  %v520_v35 = vpop.f32.mrb[7].mxu0 }
 0x1e8   : > { %v621_v36 = vmul.f32 %v609_v26, %v507_v49  ;;  %v612_v37 = vmul.f32 0.16666667, %v600_v27  ;;  %v586_v38 = vmax.f32 %v574_v28, 0.0  ;;  %v583_v39 = vadd.f32 3.0, %v569_v29 }
 0x1e9   : > { %v623_v40 = vmul.f32 %v611_v32, %v509_v54  ;;  %v604_v41 = vmin.f32 %v592_v33, 6.0  ;;  %v590_v42 = vmax.f32 %v578_v34, 0.0  ;;  %v655_v47 = vmul.f32 %v1697_v61, %v620_v31 }
 0x1ea   : > { %v624_v50 = vmul.f32 %v612_v37, %v511_v57  ;;  %v598_v51 = vmin.f32 %v586_v38, 6.0  ;;  %v595_v52 = vmax.f32 %v583_v39, 0.0  ;;  %v656_v45 = vmul.f32 %v1699_v2, %v621_v36 }
 0x1eb   : > { %v632_v55 = vpack.c.bf16 %v623_v40, %v620_v31  ;;  %v616_v56 = vmul.f32 0.16666667, %v604_v41  ;;  %v602_v58 = vmin.f32 %v590_v42, 6.0  ;;  %v658_v49 = vmul.f32 %v1697_v61, %v623_v40 }
 0x1ec   : > { %v610_v60 = vmul.f32 0.16666667, %v598_v51  ;;  %v607_v62 = vmin.f32 %v595_v52, 6.0  ;;  %v517_v54 = vadd.f32 %v516_v24, %v1686_v46  ;;  %v659_v63 = vmul.f32 %v1699_v2, %v624_v50 }
 0x1ed   : > { %v614_v8 = vmul.f32 0.16666667, %v602_v58  ;;  %v561_v0 = vadd.f32 %v560_v25, %v1684_v6  ;;  %v519_v1 = vadd.f32 %v518_v30, %v441_v4  ;;  %v521_v9 = vadd.f32 %v520_v35, %v441_v4 }
 0x1ee   : > { %v1712_v57 = vmul.f32 %v610_v60, %v558_v15  ;;  %v619_v3 = vmul.f32 0.16666667, %v607_v62  ;;  %v579_v7 = vadd.f32 3.0, %v517_v54  ;;  %v1714_v14 = vmul.f32 %v616_v56, %v566_v5  ;;  %v422_v62 = vld [vmem:[#allocation7 + $0x20] sm:$0x1] }
 0x1ef   : > { %v577_v16 = vadd.f32 3.0, %v561_v0  ;;  %v581_v18 = vadd.f32 3.0, %v519_v1  ;;  %v633_v19 = vpack.c.bf16 %v624_v50, %v621_v36  ;;  %v582_v46 = vadd.f32 3.0, %v521_v9 }
 0x1f0   : > { %v1716_v20 = vmul.f32 %v619_v3, %v569_v29  ;;  %v591_v21 = vmax.f32 %v579_v7, 0.0  ;;  %v657_v22 = vmul.f32 %v1704_v44, %v1712_v57  ;;  %v626_v24 = vmul.f32 %v614_v8, %v515_v23 }
 0x1f1   : > { %v589_v6 = vmax.f32 %v577_v16, 0.0  ;;  %v593_v25 = vmax.f32 %v581_v18, 0.0  ;;  %806 = vmatprep.subr.bf16.mxu0 %v633_v19  ;;  %v667_v15 = vadd.f32 %v656_v45, %v655_v47  ;;  %v594_v26 = vmax.f32 %v582_v46, 0.0 }
 0x1f2   : > { %v637_v4 = vpack.c.bf16 %v1716_v20, %v1714_v14  ;;  %v603_v5 = vmin.f32 %v591_v21, 6.0  ;;  %807 = vmatpush1.bf16.msra.mxu0 %v632_v55  ;;  %v671_v27 = vadd.f32 %v659_v63, %v658_v49  ;;  %v661_v23 = vmul.f32 %v1697_v61, %v626_v24 }
 0x1f3   : > { %v601_v28 = vmin.f32 %v589_v6, 6.0  ;;  %v605_v29 = vmin.f32 %v593_v25, 6.0  ;;  %v668_v30 = vadd.f32 %v667_v15, %v657_v22  ;;  %v606_v32 = vmin.f32 %v594_v26, 6.0 }
 0x1f4   : > { %v615_v31 = vmul.f32 0.16666667, %v603_v5  ;;  %v663_v45 = vmul.f32 %v1704_v44, %v1714_v14  ;;  %v666_v49 = vmul.f32 %v1704_v44, %v1716_v20  ;;  %v791_v14 = vld [vmem:[%s1808_s3] sm:$0xff] }
 0x1f5   : > { %v613_v33 = vmul.f32 0.16666667, %v601_v28  ;;  %v617_v34 = vmul.f32 0.16666667, %v605_v29  ;;  %669 = vadd.xlane.f32.xlu0 %v668_v30  ;;  %v618_v36 = vmul.f32 0.16666667, %v606_v32 }
 0x1f6   : > { %v627_v35 = vmul.f32 %v615_v31, %v517_v54 }
 0x1f7   : > { %v625_v37 = vmul.f32 %v613_v33, %v561_v0  ;;  %v629_v38 = vmul.f32 %v617_v34, %v519_v1  ;;  %v630_v40 = vmul.f32 %v618_v36, %v521_v9 }
 0x1f8   : > { %v662_v39 = vmul.f32 %v1699_v2, %v627_v35 }
 0x1f9   : > { %v634_v41 = vpack.c.bf16 %v625_v37, %v1712_v57  ;;  %v635_v42 = vpack.c.bf16 %v629_v38, %v626_v24  ;;  %v664_v47 = vmul.f32 %v1697_v61, %v629_v38  ;;  %v660_v50 = vmul.f32 %v1704_v44, %v625_v37 }
 0x1fa   : > { %v665_v51 = vmul.f32 %v1699_v2, %v630_v40  ;;  %v636_v52 = vpack.c.bf16 %v630_v40, %v627_v35  ;;  %v675_v55 = vadd.f32 %v662_v39, %v661_v23  ;;  %v1387_v2 = vmov 0.0  }
 0x1fb   : > { %v672_v56 = vadd.f32 %v671_v27, %v660_v50  ;;  %1049 = vmatprep.subr.mxu1 %v1387_v2  ;;  %1051 = vmatprep.mubr.msk.f32.mxu1 %vm1388_vm10, %v1387_v2 }
 0x1fc   : > { %808 = vmatprep.subr.bf16.mxu0 %v636_v52  ;;  %v676_v58 = vadd.f32 %v675_v55, %v663_v45  ;;  %v679_v60 = vadd.f32 %v665_v51, %v664_v47 }
 0x1fd   : > { %673 = vadd.xlane.f32.xlu1 %v672_v56  ;;  %809 = vmatpush1.bf16.msra.mxu0 %v635_v42 }
 0x1fe   : > { %677 = vadd.xlane.f32.xlu0 %v676_v58  ;;  %v680_v61 = vadd.f32 %v679_v60, %v666_v49 }
 0x202   : > { %681 = vadd.xlane.f32.xlu0 %v680_v61 }
 0x20e   : > { %707 = vrot.lane.b32.xlu1 %v1624_v10, %s1386_s9 }
 0x218   : > { %711 = vrot.lane.b32.xlu0 %v422_v62, %s1386_s9 }
 0x282   : > { %v670_v54 = vpop.xlane.xlu0 %669 }
 0x283   : > { %v683_v63 = vmul.f32 0.00390625, %v670_v54 }
 0x285   : > { %v687_v44 = vmul.f32 %v683_v63, %v1624_v10 }
 0x287   : > { %v692_v16 = vsel %vm691_vm11, %v687_v44, 0.0 }
 0x28a   : > { %v674_v8 = vpop.xlane.xlu1 %673 }
 0x28b   : > { %v684_v0 = vmul.f32 0.00390625, %v674_v8  ;;  %v678_v1 = vpop.xlane.xlu0 %677 }
 0x28c   : > { %v685_v57 = vmul.f32 0.00390625, %v678_v1 }
 0x28d   : > { %v688_v3 = vmul.f32 %v684_v0, %v1629_v12 }
 0x28e   : > { %v689_v7 = vmul.f32 %v685_v57, %v1627_v11  ;;  %v708_v9 = vpop.permute.xlu1 %707 }
 0x28f   : > { %v693_v18 = vsel %vm691_vm11, %v688_v3, 0.0  ;;  %v682_v19 = vpop.xlane.xlu0 %681  ;;  %1050 = vmatpush3.msra.mxu1 %v708_v9 }
 0x290   : > { %v694_v21 = vadd.f32 %v693_v18, %v692_v16  ;;  %v695_v46 = vsel %vm691_vm11, %v689_v7, 0.0  ;;  %v686_v22 = vmul.f32 0.00390625, %v682_v19  ;;  %1054 = vmatprep.subr.bf16.mxu1 %v1387_v2 }
 0x292   : > { %v690_v24 = vmul.f32 %v686_v22, %v1633_v13  ;;  %v696_v6 = vadd.f32 %v695_v46, %v694_v21  ;;  %v1389_v13 = vmov 41  }
 0x293   : > { %1207 = vset.pattern.permute.xlu1 %v1389_v13  ;;  %1208 = vset.pattern.permute.xlu0 %v1389_v13  ;;  %v712_v31 = vpop.permute.xlu0 %711 }
 0x294   : > { %v697_v25 = vsel %vm691_vm11, %v690_v24, 0.0  ;;  %799 = vperm.xlu1 %1207, %v1624_v10  }
 0x295   : > { %v698_v12 = vadd.f32 %v697_v25, %v696_v6 }
 0x297   : > { %v699_v15 = vrot.slane %v698_v12, 4 }
 0x299   : > { %v700_v11 = vadd.f32 %v699_v15, %v698_v12 }
 0x29b   : > { %v701_v5 = vrot.slane %v700_v11, 2 }
 0x29d   : > { %v702_v26 = vadd.f32 %v701_v5, %v700_v11 }
 0x29f   : > { %v703_v27 = vrot.slane %v702_v26, 1 }
 0x2a1   : > { %v704_v28 = vadd.f32 %v703_v27, %v702_v26 }
 0x2a3   : > { %v705_v29 = vadd.f32 %v704_v28, %v422_v62 }
 0x2a5   : > { %v706_v30 = vmax.f32 %v705_v29, 0.0 }
 0x2a7   : > { %1052 = vmatmul.mubr.msk.f32.vlgmr.msra.gmra.mrb[4].mxu1 %vm691_vm11, %v706_v30 }
 0x2a8   : > { %1055 = vmatpush3.bf16.msra.mxu1 %v634_v41  ;;  %1058 = vmatprep.mubr.msk.bf16.mxu1 %vm1388_vm10, %v1387_v2 }
 0x2a9   : > { %1056 = vmatprep.subr.bf16.mxu1 %v1387_v2 }
 0x2ac   : > { %1057 = vmatpush3.bf16.msra.mxu1 %v637_v4 }
 0x313   : > { %v800_v38 = vpop.permute.xlu1 %799 }
 0x37a   : > { %v783_v32 = vpop.f32.mrb[4].mxu1 }
 0x37b   : > { %v784_v33 = vadd.f32 %v783_v32, %v712_v31  ;;  %v1053_v34 = vpop.f32.mrb[5].mxu1 }
 0x37d   : > { %v787_v23 = vadd.f32 3.0, %v784_v33 }
 0x37f   : > { %v788_v35 = vmax.f32 %v787_v23, 0.0 }
 0x381   : > { %v789_v36 = vmin.f32 %v788_v35, 6.0 }
 0x383   : > { %v790_v37 = vmul.f32 0.16666667, %v789_v36 }
 0x385   : > { %v795_v20 = vrot.slane %v790_v37, %v642_v48 }
 0x387   : > { %v796_v4 = vmul.f32 %v795_v20, %v791_v14 }
 0x389   : > { %v797_v10 = vpack.c.bf16 %v796_v4, %v796_v4 }
 0x38b   : > { %1017 = vmatmul.mubr.msk.bf16.vlgmr.msra.gmra.mrb[8].mxu0 %vm802_vm12, %v797_v10  ;;  %1059 = vmatmul.mubr.msk.bf16.vlgmr.msra.gmra.mrb[8].mxu1 %vm802_vm12, %v797_v10 }
 0x45e   : > { %v840_v39 = vpop.f32.mrb[8].mxu0  ;;  %v881_v40 = vpop.f32.mrb[8].mxu1 }
 0x45f   : > { %v841_v41 = vadd.f32 %v840_v39, %v800_v38  ;;  %v882_v42 = vadd.f32 %v881_v40, %v800_v38  ;;  %v842_v47 = vpop.f32.mrb[9].mxu0  ;;  %v1060_v50 = vpop.f32.mrb[9].mxu1 }
 0x460   : > { %v843_v51 = vadd.f32 %v842_v47, %v800_v38  ;;  %v844_v43 = vpop.f32.mrb[10].mxu0  ;;  %v884_v48 = vpop.f32.mrb[10].mxu1 }
 0x461   : > { %v887_v52 = vadd.f32 %v841_v41, %v1654_v59  ;;  %v889_v45 = vadd.f32 %v882_v42, %v1662_v17  ;;  %v845_v55 = vpop.f32.mrb[11].mxu0  ;;  %v1061_v56 = vpop.f32.mrb[11].mxu1 }
 0x462   : > { %v888_v58 = vadd.f32 %v843_v51, %v1649_v53 }
 0x463   : > { %890 = vst [vmem:[%s269_s26] sm:$0xff] %v887_v52  ;;  %892 = vst [vmem:[%s269_s26 + $0x10] sm:$0xff] %v889_v45 }
 0x464   : > { %891 = vst [vmem:[%s269_s26 + $0x8] sm:$0xff] %v888_v58 }
 0x465   : > { %1310 = shalt.err (!%p1307_p2)
}
 0x466   : > { %s1311_s14 = scalar_lea.hbm %s1761_s28, 384  ;;  %s1315_s11 = scalar_lea.hbm %s1810_s5, 768 }
 0x467   : > { %p1312_p13 = scmp.ne.s32.totalorder %s1761_s28, %s1311_s14  ;;  %p1316_p4 = scmp.lt.u32.totalorder %s1761_s28, %s1810_s5 }
 0x468   : > { %p1317_p7 = scmp.lt.u32.totalorder %s1315_s11, %s1311_s14  ;;  %p1319_p8 = scmp.lt.u32.totalorder %s1311_s14, %s1761_s28 }
 0x469   : > { %p1313_p6 = pnand %p1312_p13, %p1824_p0 }
 0x46a   : > { %p1318_p11 = por %p1317_p7, %p1316_p4 }
 0x46b   : > { %p1314_p10 = pneg %p1313_p6 }
 0x46c   : > { %p1320_p1 = por %p1319_p8, %p1318_p11 }
 0x46e   : > { %p1321_p3 = pnand %p1320_p1, %p1314_p10 }
 0x470   : > { %1324 = shalt.err (!%p1321_p3)
}
 0x471   : > { %1075 = dma.vmem_to_hbm [thread:$0]  (%p1824_p0), %s1763_s24, 384, %s1761_s28, %s894_s12  }
 0x472 PF: > { %s920_s23 = sand.u32 1, %s1355_s18   ;;  %p1825_p5 = scmp.ne.s32.totalorder %s1815_s25, 0 }
 0x473   : > { %p1826_p9 = scmp.ge.s32.totalorder %s1367_s21, 2  ;;  %s921_s26 = scalar_lea.sflag [#allocation4], %s920_s23 }
 0x475   : > { %p1089_p12 = pnand %p1826_p9, %p1825_p5 }
 0x477   : > { %1350 = dma.done.wait (!%p1089_p12), %s921_s26, 384  }
 0x478   : > { %1352 = vsyncadd (!%p1089_p12), %s921_s26, 4294966912  ;;  %p19_p2 = scmp.ge.s32.totalorder %s1531_s16, 4   ;;  %s1827_s18 = smov %s1359_s19 }
 0x479   : > { %s1828_s19 = smov %s1363_s20  ;;  %s1829_s20 = smov %s1540_s27 }
 0x47a   : > { %s1830_s21 = smov %s1531_s16  ;;  %21 = sbr.rel (!%p19_p2) target bundleno = 6 (0x6), region = 93 }
 0x481   :  { %926 = vsyncpa [#allocation3], 1 }
 0x482   :  { %928 = vsyncpa [#allocation3 + $0x1], 1 }
 0x483   :  { %929 = vsyncpa [#allocation6], 1 }
 0x484   :  { %930 = vsyncpa [#allocation4], 1 }
 0x485   :  { %932 = vsyncpa [#allocation4 + $0x1], 1 }

</bundles_post_ra>
